<compile_context>
chip_gen: v6e
topology: v6e:2x2x1
jax: 0.10.0
libtpu: 0.0.40
codegen_flags: <defaults>
</compile_context>

<pallas_src>
import functools

import jax
import jax.numpy as jnp
from jax import lax
from jax.experimental import pallas as pl
from jax.experimental.pallas import tpu as pltpu


def _conv_gemm_kernel(p_ref, w_ref, b_ref, o_ref, *, apply_relu):
    """One (batch, spatial-tile) grid step: a single fused GEMM + bias + ReLU.

    p_ref: (1, KKC, TS)  im2col patches, spatial positions on the lane axis
    w_ref: (O, KKC)      flattened conv weights
    b_ref: (O, 1)        bias
    o_ref: (1, O, TS)    output tile (lane-dense stores)
    """
    patches = p_ref[0]                                   # (KKC, TS)
    acc = jnp.dot(w_ref[...], patches,
                  preferred_element_type=jnp.float32)    # (O, TS), f32 accum
    acc = acc + b_ref[...]                               # (O, 1) lane-broadcast
    if apply_relu:
        acc = jnp.maximum(acc, 0.0)
    o_ref[0] = acc.astype(o_ref.dtype)


def _pick_spatial_tile(spatial, kkc, n_batch, *, vmem_cap_bytes=4 << 20,
                       min_steps=4):
    """Pick the lane-aligned spatial tile size.

    Largest multiple of 128 dividing `spatial` whose double-buffered in+out
    blocks fit the VMEM budget, shrunk (if divisors allow) until the grid has
    at least `min_steps` steps (pipeline depth / v7x dual-core work).
    """
    if spatial % 128 != 0:
        return spatial  # block == full dim is always legal (toy/ragged sizes)
    cands = [t for t in range(128, spatial + 1, 128) if spatial % t == 0]
    fitting = [t for t in cands
               if 2 * 4 * (kkc * t + 8 * t) <= vmem_cap_bytes] or [cands[0]]
    idx = len(fitting) - 1
    ts = fitting[idx]
    while n_batch * (spatial // ts) < min_steps and idx > 0:
        idx -= 1
        ts = fitting[idx]
    return ts


def conv_layer_forward(x_nchw, weight_oihw, bias, *, kernel_size, stride,
                       is_last=False):
    """Pallas equivalent of ConvLayer.forward (NCHW in, NCHW out).

    x_nchw:      (N, C, H, W)  float32
    weight_oihw: (O, C, K, K)  float32  (PyTorch Conv2d layout)
    bias:        (O,)          float32
    """
    N, C, H, W = x_nchw.shape
    O = weight_oihw.shape[0]
    K = kernel_size
    pad = K // 2  # reflection padding = floor(kernel_size / 2)

    # --- wrapper glue (plain JAX): reflection pad + im2col ----------------
    x_pad = jnp.pad(x_nchw, ((0, 0), (0, 0), (pad, pad), (pad, pad)),
                    mode="reflect")
    Hp, Wp = H + 2 * pad, W + 2 * pad
    Ho = (Hp - K) // stride + 1
    Wo = (Wp - K) // stride + 1
    KKC = K * K * C
    S = Ho * Wo

    # im2col, channel-major, ordered (kh, kw, c) to match the weight flatten.
    cols = []
    for kh in range(K):
        for kw in range(K):
            cols.append(x_pad[:, :,
                              kh:kh + stride * (Ho - 1) + 1:stride,
                              kw:kw + stride * (Wo - 1) + 1:stride])
    patches = jnp.concatenate(cols, axis=1).reshape(N, KKC, S)

    # (O, C, K, K) -> (O, K, K, C) -> (O, K*K*C): index (kh*K + kw)*C + c.
    w2d = jnp.transpose(weight_oihw, (0, 2, 3, 1)).reshape(O, KKC)
    b2d = bias.reshape(O, 1)

    TS = _pick_spatial_tile(S, KKC, N)
    grid = (N, S // TS)

    kernel = functools.partial(_conv_gemm_kernel, apply_relu=not is_last)

    out = pl.pallas_call(
        kernel,
        out_shape=jax.ShapeDtypeStruct((N, O, S), jnp.float32),
        grid_spec=pltpu.PrefetchScalarGridSpec(
            num_scalar_prefetch=0,
            grid=grid,
            in_specs=[
                pl.BlockSpec((1, KKC, TS), lambda n, s: (n, 0, s)),
                pl.BlockSpec((O, KKC), lambda n, s: (0, 0)),
                pl.BlockSpec((O, 1), lambda n, s: (0, 0)),
            ],
            out_specs=pl.BlockSpec((1, O, TS), lambda n, s: (n, 0, s)),
        ),
        compiler_params=pltpu.CompilerParams(
            dimension_semantics=("parallel", "parallel"),
            vmem_limit_bytes=32 * 1024 * 1024),
    )(patches, w2d, b2d)

    # Flattened-spatial NCHW -> NCHW (free reshape; no transpose needed).
    return out.reshape(N, O, Ho, Wo)


def _reference(x, w, b, *, kernel_size, stride, is_last):
    pad = kernel_size // 2
    xp = jnp.pad(x, ((0, 0), (0, 0), (pad, pad), (pad, pad)), mode="reflect")
    out = lax.conv_general_dilated(
        xp, w, window_strides=(stride, stride), padding="VALID",
        dimension_numbers=("NCHW", "OIHW", "NCHW"))
    out = out + b.reshape(1, -1, 1, 1)
    if not is_last:
        out = jnp.maximum(out, 0.0)
    return out


if __name__ == "__main__":
    # Module config: ConvLayer(in_channels=4, out_channels=8, kernel_size=3,
    #                          stride=1, is_last=False)
    in_channels, out_channels, kernel_size = 4, 8, 3

    key = jax.random.PRNGKey(0)
    kx, kw, kb = jax.random.split(key, 3)

    fan_in = in_channels * kernel_size * kernel_size
    bound = 1.0 / (fan_in ** 0.5)
    weight = jax.random.uniform(kw, (out_channels, in_channels,
                                     kernel_size, kernel_size),
                                jnp.float32, minval=-bound, maxval=bound)
    bias = jax.random.uniform(kb, (out_channels,), jnp.float32,
                              minval=-bound, maxval=bound)

    # input: (N, C, H, W)
    x = jax.random.normal(kx, (2, 4, 16, 16), jnp.float32)

    # main config: stride=1, ReLU applied
    out = conv_layer_forward(x, weight, bias, kernel_size=kernel_size,
                             stride=1, is_last=False)
    out = jax.block_until_ready(out)
    ref = _reference(x, weight, bias, kernel_size=kernel_size, stride=1,
                     is_last=False)
    assert out.shape == ref.shape == (2, out_channels, 16, 16)
    assert jnp.allclose(out, ref, atol=1e-5, rtol=1e-5)

    # secondary config: stride=2, is_last=True (no ReLU) -- exercises the
    # strided im2col path and the fall-back spatial tile (Ho*Wo not %128).
    out2 = conv_layer_forward(x, weight, bias, kernel_size=kernel_size,
                              stride=2, is_last=True)
    out2 = jax.block_until_ready(out2)
    ref2 = _reference(x, weight, bias, kernel_size=kernel_size, stride=2,
                      is_last=True)
    assert out2.shape == ref2.shape == (2, out_channels, 8, 8)
    assert jnp.allclose(out2, ref2, atol=1e-5, rtol=1e-5)

    print("KERNEL_OK")
</pallas_src>

<mosaic_0001>
module attributes {stable_mosaic.version = 11 : i64} {
  func.func @_conv_gemm_kernel(%arg0: i32, %arg1: i32, %arg2: memref<1x36x128xf32, #tpu.memory_space<vmem>>, %arg3: memref<8x36xf32, #tpu.memory_space<vmem>>, %arg4: memref<8x1xf32, #tpu.memory_space<vmem>>, %arg5: memref<1x8x128xf32, #tpu.memory_space<vmem>>) attributes {dimension_semantics = [#tpu.dimension_semantics<parallel>, #tpu.dimension_semantics<parallel>], iteration_bounds = array<i64: 2, 2>, scalar_prefetch = 0 : i64, scratch_operands = 0 : i64, tpu.core_type = #tpu.core_type<tc>, window_params = [{transform_indices = @transform_0, window_bounds = array<i64: 1, 36, 128>}, {pipeline_mode = #tpu.pipeline_mode<synchronous>, transform_indices = @transform_1, window_bounds = array<i64: 8, 36>}, {pipeline_mode = #tpu.pipeline_mode<synchronous>, transform_indices = @transform_2, window_bounds = array<i64: 8, 1>}, {transform_indices = @transform_3, window_bounds = array<i64: 1, 8, 128>}]} {
    %c0 = arith.constant 0 : index
    %c0_0 = arith.constant 0 : index
    %c0_1 = arith.constant 0 : index
    %0 = vector.load %arg2[%c0, %c0_0, %c0_1] : memref<1x36x128xf32, #tpu.memory_space<vmem>>, vector<1x36x128xf32>
    %1 = vector.shape_cast %0 : vector<1x36x128xf32> to vector<36x128xf32>
    %c0_2 = arith.constant 0 : index
    %c0_3 = arith.constant 0 : index
    %2 = vector.load %arg3[%c0_2, %c0_3] : memref<8x36xf32, #tpu.memory_space<vmem>>, vector<8x36xf32>
    %cst = arith.constant dense<0.000000e+00> : vector<8x128xf32>
    %3 = tpu.matmul %2, %1, %cst {dimension_numbers = #tpu.dot_dimension_numbers<[1], [0], [0], [1], [0, 0, 1, 1], [], []>} : vector<8x36xf32>, vector<36x128xf32>, vector<8x128xf32> -> vector<8x128xf32>
    %c0_4 = arith.constant 0 : index
    %c0_5 = arith.constant 0 : index
    %4 = vector.load %arg4[%c0_4, %c0_5] : memref<8x1xf32, #tpu.memory_space<vmem>>, vector<8x1xf32>
    %5 = vector.broadcast %4 : vector<8x1xf32> to vector<8x128xf32>
    %6 = arith.addf %3, %5 : vector<8x128xf32>
    %cst_6 = arith.constant 0.000000e+00 : f32
    %7 = vector.broadcast %cst_6 : f32 to vector<8x128xf32>
    %8 = arith.maximumf %6, %7 : vector<8x128xf32>
    %c0_7 = arith.constant 0 : index
    %c0_8 = arith.constant 0 : index
    %c0_9 = arith.constant 0 : index
    %9 = vector.load %arg5[%c0_7, %c0_8, %c0_9] : memref<1x8x128xf32, #tpu.memory_space<vmem>>, vector<1x8x128xf32>
    %10 = vector.shape_cast %9 : vector<1x8x128xf32> to vector<8x128xf32>
    %11 = vector.shape_cast %8 : vector<8x128xf32> to vector<1x8x128xf32>
    tpu.vector_store %arg5[%c0_7, %c0_8, %c0_9], %11 {strides = array<i32>} : memref<1x8x128xf32, #tpu.memory_space<vmem>>, vector<1x8x128xf32>,
    return
  }
  func.func @transform_0(%arg0: i32, %arg1: i32) -> (i32, i32, i32) {
    %c0_i32 = arith.constant 0 : i32
    %c0_i32_0 = arith.constant 0 : i32
    return %arg0, %c0_i32, %arg1 : i32, i32, i32
  }
  func.func @transform_1(%arg0: i32, %arg1: i32) -> (i32, i32) {
    %c0_i32 = arith.constant 0 : i32
    %c0_i32_0 = arith.constant 0 : i32
    %c0_i32_1 = arith.constant 0 : i32
    return %c0_i32, %c0_i32_0 : i32, i32
  }
  func.func @transform_2(%arg0: i32, %arg1: i32) -> (i32, i32) {
    %c0_i32 = arith.constant 0 : i32
    %c0_i32_0 = arith.constant 0 : i32
    %c0_i32_1 = arith.constant 0 : i32
    return %c0_i32, %c0_i32_0 : i32, i32
  }
  func.func @transform_3(%arg0: i32, %arg1: i32) -> (i32, i32, i32) {
    %c0_i32 = arith.constant 0 : i32
    %c0_i32_0 = arith.constant 0 : i32
    return %arg0, %c0_i32, %arg1 : i32, i32, i32
  }
}

</mosaic_0001>

<bundles_post_ra>
// kernel: tpu_custom_call.1
= control target key start
LH: loop header
LB: loop body
LE: loop exit
PB: predicated region body
PF: predicated region fallthrough
CT: control target
= control target key end

     0   :  { %8 = vsyncpa [#allocation4], 0  ;;  %s797_s0 = inlined_call_operand.vmem [shape: f32[2,36,256], index: 0, kind: input, shape index: {}]   ;;  %s798_s1 = inlined_call_operand.vmem [shape: f32[8,36], index: 1, kind: input, shape index: {}]   ;;  %s799_s2 = inlined_call_operand.vmem [shape: f32[8,1], index: 2, kind: input, shape index: {}]   ;;  %s800_s3 = inlined_call_operand.hbm [shape: f32[2,8,256], index: 3, kind: output, shape index: {}]  }
   0x1   :  { %10 = vsyncpa [#allocation4 + $0x1], 0  ;;  %s655_s12 = smov 0   ;;  %s657_s13 = smov 0  }
   0x2   :  { %s659_s14 = smov 0   ;;  %s661_s15 = smov 0  }
   0x3   :  { %s663_s16 = smov 0   ;;  %s665_s17 = smov 0  }
   0x4   :  { %s667_s18 = smov 0   ;;  %s669_s19 = smov 0  }
   0x5 LB: > { %s426_s20 = sadd.s32 4294967295, %s629_s19   ;;  %s427_s21 = sadd.s32 4294967294, %s629_s19   ;;  %s629_s19 = sphi %s669_s19, %s16_s19   ;;  %s625_s18 = sphi %s667_s18, %s810_s18   ;;  %s621_s17 = sphi %s665_s17, %s809_s17   ;;  %s617_s16 = sphi %s663_s16, %s808_s16   ;;  %s613_s15 = sphi %s661_s15, %s807_s15   ;;  %s609_s14 = sphi %s659_s14, %s806_s14   ;;  %s605_s13 = sphi %s657_s13, %s805_s13   ;;  %s601_s12 = sphi %s655_s12, %s804_s12  }
   0x6   : > { %s25_s22 = sadd.s32 1, %s621_s17  ;;  %s28_s23 = sadd.s32 1, %s625_s18 }
   0x7   : > { %p26_p0 = scmp.ge.s32.totalorder %s25_s22, 2  ;;  %p44_p1 = scmp.ne.s32.totalorder %s609_s14, %s605_s13 }
   0x8   : > { %p45_p2 = scmp.eq.s32.totalorder %s629_s19, 0  ;;  %p118_p5 = scmp.eq.s32.totalorder %s426_s20, 3 }
   0x9   : > { %s812_s22 = smov (%p26_p0, %s25_s22), 0  ;;  %s814_s23 = smov (!%p26_p0, %s28_s23), %s625_s18 }
   0xa   : > { %s33_s24 = ssub.s32 %s621_s17, %s812_s22  ;;  %p707_p3 = por %p45_p2, %p44_p1 }
   0xb   : > { %p30_p4 = scmp.ge.s32.totalorder %s814_s23, 2  ;;  %p123_p6 = scmp.ne.s32.totalorder %s605_s13, %s601_s12 }
   0xc   : > { %p124_p7 = scmp.eq.s32.totalorder %s427_s21, 3  ;;  %p715_p8 = por %p118_p5, %p44_p1 }
   0xd   : > { %s816_s23 = smov (%p30_p4, %s814_s23), 0  ;;  %s37_s30 = sadd.s32 1, %s609_s14 }
   0xe   : > { %p719_p9 = por %p124_p7, %p123_p6  ;;  %s32_s28 = ssub.s32 %s625_s18, %s816_s23 }
   0xf   : > { %s34_s29 = sor.u32 %s33_s24, %s32_s28  ;;  %p429_p11 = scmp.ge.s32.totalorder %s629_s19, 4 }
  0x10   : > { %p35_p10 = scmp.eq.s32.totalorder %s34_s29, 0 }
  0x11   : > { %146 = sbr.rel (%p429_p11) target bundleno = 32 (0x20), region = 24 }
  0x12   : > { %s727_s4 = scalar_select %p35_p10, %s609_s14, %s37_s30  }
  0x16   : > { %149 = sbr.rel (!%p707_p3) target bundleno = 32 (0x20), region = 28  ;;  %s151_s5 = sand.u32 (%p707_p3), 1, %s609_s14  }
  0x17   : > { %s460_s6 = smul.u32 (%p707_p3), 10, %s625_s18 }
  0x18   : > { %s459_s7 = smul.u32 (%p707_p3), 40, %s151_s5 }
  0x19   : > { %s155_s8 = sadd.s32 (%p707_p3), %s621_s17, %s460_s6 }
  0x1a   : > { %s430_s9 = sshll.u32 (%p707_p3), %s155_s8, 3  ;;  %s153_s21 = scalar_lea.vmem (%p707_p3), [#allocation2], %s459_s7 }
  0x1b   : > { %s157_s20 = scalar_lea.vmem %s797_s0, %s430_s9 }
  0x1c   : > { %v194_v0 = vld [vmem:[%s157_s20] sm:$0xff]  ;;  %v196_v1 = vld [vmem:[%s157_s20 + $0x10] sm:$0xff] }
  0x1d   : > { %v198_v2 = vld [vmem:[%s157_s20 + $0x20] sm:$0xff]  ;;  %195 = vst [vmem:[%s153_s21] sm:$0xff] %v194_v0  ;;  %197 = vst [vmem:[%s153_s21 + $0x8] sm:$0xff] %v196_v1  ;;  %v200_v3 = vld [vmem:[%s157_s20 + $0x30] sm:$0xff] }
  0x1e   : > { %199 = vst [vmem:[%s153_s21 + $0x10] sm:$0xff] %v198_v2  ;;  %v202_v4 = vld [vmem:[%s157_s20 + $0x40] sm:$0xff]  ;;  %201 = vst [vmem:[%s153_s21 + $0x18] sm:$0xff] %v200_v3 }
  0x1f   : > { %203 = vst [vmem:[%s153_s21 + $0x20] sm:$0xff] %v202_v4 }
  0x20 PF: > { %p431_p12 = scmp.ge.s32.totalorder %s629_s19, 1  ;;  %p208_p13 = scmp.lt.s32.totalorder %s629_s19, 5 }
  0x22   : > { %p209_p0 = pnand %p431_p12, %p208_p13 }
  0x23   : > { %s741_s24 = sand.u32 (!%p209_p0), 1, %s605_s13   ;;  %s436_s8 = sshll.u32 (!%p209_p0), %s617_s16, 1 }
  0x24   : > { %212 = sbr.rel (%p209_p0) target bundleno = 262 (0x106), region = 66  ;;  %s432_s7 = sshll.u32 (!%p209_p0), %s741_s24, 3 }
  0x25   : > { %s461_s25 = smul.u32 (!%p209_p0), 40, %s741_s24  ;;  %s342_s9 = sadd.s32 (!%p209_p0), %s613_s15, %s436_s8 }
  0x26   : > { %s437_s10 = sshll.u32 (!%p209_p0), %s342_s9, 7  ;;  %s237_s11 = scalar_lea.vmem (!%p209_p0), [#allocation3], %s432_s7 }
  0x27   : > { %s217_s30 = scalar_lea.vmem (!%p209_p0), [#allocation2], %s461_s25  ;;  %s346_s20 = sshll.u32 (!%p209_p0), %s237_s11, 4  ;;  %s347_s20 = int_to_ptr.vmem [resolvable:$true] %s346_s20 }
  0x28   : > { %s344_s28 = scalar_lea.hbm (!%p209_p0), %s800_s3, %s437_s10  ;;  %s331_s29 = scalar_lea.sflag (!%p209_p0), [#allocation4], %s741_s24 }
  0x29   : > { %v631_v5 = vmov 0.0   ;;  %vm632_vm0 = vmmov 0   ;;  %v244_v6 = vld [vmem:[%s799_s2] sm:$0xff]  ;;  %vm254_vm1 = vcmask 1043456   ;;  %v633_v7 = vmov 0   ;;  %v240_v10 = vld [vmem:[%s217_s30 + $0x10] sm:$0xff] }
  0x2a   : > { %446 = vmatprep.subr.mxu0 %v631_v5  ;;  %456 = vmatprep.mubr.msk.f32.mxu0 %vm632_vm0, %v631_v5  ;;  %v242_v8 = vld [vmem:[%s217_s30 + $0x20] sm:$0xf]  ;;  %v241_v9 = vld [vmem:[%s217_s30 + $0x18] sm:$0xff]  ;;  %v239_v11 = vld [vmem:[%s217_s30 + $0x8] sm:$0xff]  ;;  %vm250_vm2 = vcmask 293888   ;;  %s634_s15 = smov [#allocation3]  }
  0x2b   : > { %536 = vset.pattern.permute.xlu0 %v633_v7  ;;  %447 = vmatpush3.msk.msra.mxu0 %vm254_vm1, %v242_v8  ;;  %v238_v12 = vld [vmem:[%s217_s30] sm:$0xff]  ;;  %s537_s30 = scalar_lea.vmem %s347_s20, 128  ;;  %s541_s16 = sshll.u32 %s634_s15, 4  ;;  %s542_s16 = int_to_ptr.vmem [resolvable:$false] %s541_s16 }
  0x2c   : > { %247 = vperm.xlu0 %536, %v244_v6   ;;  %448 = vmatprep.subr.mxu0 %v631_v5  ;;  %v243_v13 = vld [vmem:[%s798_s1] sm:$0xff]  ;;  %p538_p1 = scmp.ne.s32.totalorder %s347_s20, %s537_s30  ;;  %s543_s5 = scalar_lea.vmem %s542_s16, 256 }
  0x2d   : > { %449 = vmatpush3.msra.mxu0 %v241_v9  ;;  %p544_p4 = scmp.lt.s32.totalorder %s347_s20, %s542_s16  ;;  %p545_p5 = scmp.lt.s32.totalorder %s543_s5, %s537_s30 }
  0x2e   : > { %450 = vmatprep.subr.mxu0 %v631_v5  ;;  %p539_p2 = pnand %p538_p1, %p715_p8 }
  0x2f   : > { %451 = vmatpush3.msra.mxu0 %v240_v10  ;;  %p546_p6 = por %p545_p5, %p544_p4 }
  0x30   : > { %452 = vmatprep.subr.mxu0 %v631_v5  ;;  %p540_p3 = pneg %p539_p2 }
  0x31   : > { %453 = vmatpush3.msra.mxu0 %v239_v11 }
  0x32   : > { %454 = vmatprep.subr.mxu0 %v631_v5  ;;  %p547_p7 = pnand %p546_p6, %p540_p3 }
  0x33   : > { %455 = vmatpush3.msra.mxu0 %v238_v12 }
  0x34   : > { %457 = vmatmul.mubr.msk.f32.vlgmr.msra.gmra.mxu0 %vm250_vm2, %v243_v13 }
  0xa7   : > { %v248_v14 = vpop.permute.xlu0 %247 }
  0xf4   : > { %v324_v15 = vpop.f32.mrf.mxu0 }
  0xf5   : > { %v325_v16 = vadd.f32 %v324_v15, %v248_v14 }
  0xf6   : > { %v458_v17 = vpop.f32.mrf.mxu0 }
  0xf7   : > { %v328_v18 = vmax.f32 %v325_v16, 0.0 }
  0xf9   : > { %329 = vst [vmem:[%s237_s11] sm:$0xff] %v328_v18 }
  0xfa   : > { %550 = shalt.err (!%p547_p7)
}
  0xfb   : > { %s551_s6 = scalar_lea.hbm %s344_s28, 128  ;;  %s555_s8 = scalar_lea.hbm %s800_s3, 512 }
  0xfc   : > { %p552_p10 = scmp.ne.s32.totalorder %s344_s28, %s551_s6  ;;  %p556_p13 = scmp.lt.s32.totalorder %s344_s28, %s800_s3 }
  0xfd   : > { %p557_p0 = scmp.lt.s32.totalorder %s555_s8, %s551_s6 }
  0xfe   : > { %p553_p11 = pnand %p552_p10, %p715_p8 }
  0xff   : > { %p558_p1 = por %p557_p0, %p556_p13 }
 0x100   : > { %p554_p12 = pneg %p553_p11 }
 0x102   : > { %p559_p2 = pnand %p558_p1, %p554_p12 }
 0x104   : > { %562 = shalt.err (!%p559_p2)
}
 0x105   : > { %462 = dma.vmem_to_hbm [thread:$0]  (%p715_p8), %s347_s20, 128, %s344_s28, %s331_s29  }
 0x106 PF: > { %p468_p3 = scmp.ge.s32.totalorder %s629_s19, 2  ;;  %s358_s11 = sand.u32 1, %s601_s12  }
 0x107   : > { %s359_s21 = scalar_lea.sflag [#allocation4], %s358_s11 }
 0x108   : > { %p465_p4 = pnand %p468_p3, %p719_p9 }
 0x10a   : > { %p466_p5 = pneg %p465_p4 }
 0x10c   : > { %596 = dma.done.wait (%p466_p5), %s359_s21, 128  }
 0x10d   : > { %598 = vsyncadd (%p466_p5), %s359_s21, 4294967168  ;;  %s16_s19 = sadd.s32 1, %s629_s19   ;;  %s804_s12 = smov %s605_s13 }
 0x10e   : > { %p13_p6 = scmp.ge.s32.totalorder %s16_s19, 6   ;;  %s805_s13 = smov %s609_s14 }
 0x10f   : > { %s806_s14 = smov %s727_s4  ;;  %s807_s15 = smov %s621_s17 }
 0x110   : > { %s808_s16 = smov %s625_s18  ;;  %s809_s17 = smov %s812_s22 }
 0x111   : > { %s810_s18 = smov %s816_s23  ;;  %15 = sbr.rel (!%p13_p6) target bundleno = 5 (0x5), region = 110 }
 0x116   :  { %364 = vsyncpa [#allocation4], 1 }
 0x117   :  { %366 = vsyncpa [#allocation4 + $0x1], 1 }

</bundles_post_ra>
